<compile_context>
chip_gen: v7x
topology: tpu7x:2x2x1
jax: 0.10.0
libtpu: 0.0.40
codegen_flags: <defaults>
</compile_context>

<pallas_src>
import functools

import jax
import jax.numpy as jnp
from jax.experimental import pallas as pl
from jax.experimental.pallas import tpu as pltpu

PAD_R = 8      # sublane padding for the fused weight+bias tile
PAD_C = 128    # lane padding

IN_RAW = 2     # raw input dim
IN_FEAT = 4    # [x0, x1, x0^2, x1^2]
OUT_FC1 = 15
BIAS_ROW = 4   # row of the fused tile that holds fc1.bias

TILE_B = 8     # batch tile (sublane multiple) for the batched variant


# ---------------------------------------------------------------------------
# Kernels
# ---------------------------------------------------------------------------
def critic_kernel(x_ref, wb_ref, o_ref):
    # x_ref:  SMEM (2,)      f32 -- the raw 2-dim state.
    # wb_ref: VMEM (8,128)   f32 -- rows 0..3 = fc1.weight^T, row 4 = fc1.bias.
    # o_ref:  VMEM (1,128)   f32 -- lanes 0..14 get the result.
    x0 = x_ref[0]
    x1 = x_ref[1]
    x0sq = x0 * x0            # scalar ALU (slot otherwise idle -> free)
    x1sq = x1 * x1

    w0 = wb_ref[pl.ds(0, 1), :]          # weight row for feature x0
    w1 = wb_ref[pl.ds(1, 1), :]          # weight row for feature x1
    w2 = wb_ref[pl.ds(2, 1), :]          # weight row for feature x0^2
    w3 = wb_ref[pl.ds(3, 1), :]          # weight row for feature x1^2
    b = wb_ref[pl.ds(BIAS_ROW, 1), :]    # bias row

    # 4 independent scalar-broadcast vmuls + balanced add tree (no f32 FMA on
    # the VPU, so every saved vmul / shortened dep-chain add is a real bundle).
    o_ref[...] = (x0 * w0 + x1 * w1) + (x0sq * w2 + x1sq * w3) + b


def critic_batched_kernel(x_ref, wb_ref, o_ref):
    # x_ref:  VMEM (TILE_B, 2)   f32 -- a tile of raw states (batch on sublanes).
    # wb_ref: VMEM (8, 128)      f32 -- fused weight+bias tile (shared by all tiles).
    # o_ref:  VMEM (TILE_B, 128) f32 -- lanes 0..14 get each row's result.
    x0 = x_ref[:, 0:1]        # (TILE_B, 1)
    x1 = x_ref[:, 1:2]        # (TILE_B, 1)
    x0sq = x0 * x0
    x1sq = x1 * x1

    w0 = wb_ref[pl.ds(0, 1), :]          # (1, 128)
    w1 = wb_ref[pl.ds(1, 1), :]
    w2 = wb_ref[pl.ds(2, 1), :]
    w3 = wb_ref[pl.ds(3, 1), :]
    b = wb_ref[pl.ds(BIAS_ROW, 1), :]

    # (TILE_B,1)x(1,128) lane-broadcast MACs on the VPU; bias sublane-broadcast.
    o_ref[...] = (x0 * w0 + x1 * w1) + (x0sq * w2 + x1sq * w3) + b


# ---------------------------------------------------------------------------
# One-time parameter packing (kept resident on device)
# ---------------------------------------------------------------------------
def prepare_fc1_fused(w1, b1):
    """Build the fused, padded fc1 parameter tile ONCE.

    w1: (15, 4) torch-layout (out x in) float32
    b1: (15,)   float32
    Returns a single (8, 128) f32 tile: rows 0..3 = w1^T, row 4 = b1.
    """
    wb = jnp.zeros((PAD_R, PAD_C), jnp.float32)
    wb = wb.at[:IN_FEAT, :OUT_FC1].set(w1.T.astype(jnp.float32))
    wb = wb.at[BIAS_ROW, :OUT_FC1].set(b1.astype(jnp.float32))
    return wb


# ---------------------------------------------------------------------------
# Wrappers
# ---------------------------------------------------------------------------
@jax.jit
def critic_forward(x, wb_pad):
    """Single-state forward.

    x: (2,) f32 state; wb_pad: (8,128) fused tile.
    Returns the PADDED (1,128) block; the value lives in [0, :15].
    """
    return pl.pallas_call(
        critic_kernel,
        out_shape=jax.ShapeDtypeStruct((1, PAD_C), jnp.float32),
        in_specs=[
            pl.BlockSpec(memory_space=pltpu.MemorySpace.SMEM),   # x scalars
            pl.BlockSpec(memory_space=pltpu.MemorySpace.VMEM),   # fused W+b tile
        ],
        out_specs=pl.BlockSpec(memory_space=pltpu.MemorySpace.VMEM),
    )(x.astype(jnp.float32), wb_pad)


@functools.partial(jax.jit, static_argnames=("tile_b",))
def critic_forward_batched(xb, wb_pad, tile_b=TILE_B):
    """Batched forward.

    xb: (B, 2) f32 states; wb_pad: (8,128) fused tile.
    Returns the PADDED (B_pad, 128) block; row i's value lives in [i, :15].
    """
    xb = xb.astype(jnp.float32)
    B = xb.shape[0]
    B_pad = pl.cdiv(B, tile_b) * tile_b
    if B_pad != B:
        xb = jnp.pad(xb, ((0, B_pad - B), (0, 0)))

    return pl.pallas_call(
        critic_batched_kernel,
        out_shape=jax.ShapeDtypeStruct((B_pad, PAD_C), jnp.float32),
        grid_spec=pltpu.PrefetchScalarGridSpec(
            num_scalar_prefetch=0,
            grid=(B_pad // tile_b,),
            in_specs=[
                pl.BlockSpec((tile_b, IN_RAW), lambda i: (i, 0)),
                pl.BlockSpec((PAD_R, PAD_C), lambda i: (0, 0)),
            ],
            out_specs=pl.BlockSpec((tile_b, PAD_C), lambda i: (i, 0)),
        ),
        compiler_params=pltpu.CompilerParams(
            dimension_semantics=("parallel",),   # megacore batch sharding (v7x)
        ),
    )(xb, wb_pad)


# ---------------------------------------------------------------------------
# Parameter init (deterministic, mirrors the module's __init__ shapes)
# ---------------------------------------------------------------------------
def init_params(key):
    k1, k2, k3, k4, k5, k6 = jax.random.split(key, 6)

    def uniform_init(k, shape, fan_in):
        bound = 1.0 / jnp.sqrt(fan_in)
        return jax.random.uniform(k, shape, jnp.float32, -bound, bound)

    # NOTE: torch's declared Linear(2,15) would init with fan_in=2; weights are
    # sized (15,4) here so the forward as written is computable (init
    # distribution fidelity only, no effect on forward math).
    params = {
        "fc1_w": uniform_init(k1, (OUT_FC1, IN_FEAT), IN_RAW),
        "fc1_b": uniform_init(k2, (OUT_FC1,), IN_RAW),
        # unused in forward, kept for shape fidelity with __init__:
        "fc2_w": uniform_init(k3, (8, 15), 15),
        "fc2_b": uniform_init(k4, (8,), 15),
        "fc3_w": uniform_init(k5, (1, 8), 8),
        "fc3_b": uniform_init(k6, (1,), 8),
    }
    return params


if __name__ == "__main__":
    key = jax.random.PRNGKey(0)
    k_x, k_xb, k_p = jax.random.split(key, 3)

    x = jax.random.normal(k_x, (IN_RAW,), jnp.float32)        # single state (2,)
    B = 16
    xb = jax.random.normal(k_xb, (B, IN_RAW), jnp.float32)    # batched states (16,2)
    params = init_params(k_p)

    # One-time fused padding of fc1 weight+bias (kept resident on device).
    wb_pad = prepare_fc1_fused(params["fc1_w"], params["fc1_b"])

    # --- single-state path ---
    y_pad = critic_forward(x, wb_pad)
    y_pad = jax.block_until_ready(y_pad)
    y = y_pad[0, :OUT_FC1]                                    # consumer-side index

    feat_ref = jnp.concatenate([x, x * x], axis=0)            # (4,)
    y_ref = feat_ref @ params["fc1_w"].T + params["fc1_b"]    # (15,)

    assert y_pad.shape == (1, PAD_C), y_pad.shape
    assert jnp.allclose(y, y_ref, atol=1e-5, rtol=1e-5), (y, y_ref)

    # --- batched path ---
    yb_pad = critic_forward_batched(xb, wb_pad)
    yb_pad = jax.block_until_ready(yb_pad)
    yb = yb_pad[:B, :OUT_FC1]                                 # consumer-side index

    feat_b = jnp.concatenate([xb, xb * xb], axis=1)           # (B, 4)
    yb_ref = feat_b @ params["fc1_w"].T + params["fc1_b"]     # (B, 15)

    assert yb_pad.shape[1] == PAD_C and yb_pad.shape[0] % TILE_B == 0, yb_pad.shape
    assert jnp.allclose(yb, yb_ref, atol=1e-5, rtol=1e-5), (yb, yb_ref)

    print("KERNEL_OK")
</pallas_src>

<mosaic_0001>
module attributes {stable_mosaic.version = 11 : i64} {
  func.func @critic_kernel(%arg0: memref<2xf32, #tpu.memory_space<smem>>, %arg1: memref<8x128xf32, #tpu.memory_space<vmem>>, %arg2: memref<1x128xf32, #tpu.memory_space<vmem>>) attributes {dimension_semantics = [], scalar_prefetch = 0 : i64, scratch_operands = 0 : i64, tpu.core_type = #tpu.core_type<tc>} {
    %c0 = arith.constant 0 : index
    %0 = memref.load %arg0[%c0] : memref<2xf32, #tpu.memory_space<smem>>
    %c1 = arith.constant 1 : index
    %1 = memref.load %arg0[%c1] : memref<2xf32, #tpu.memory_space<smem>>
    %2 = arith.mulf %0, %0 : f32
    %3 = arith.mulf %1, %1 : f32
    %c0_0 = arith.constant 0 : index
    %c0_1 = arith.constant 0 : index
    %4 = vector.load %arg1[%c0_0, %c0_1] : memref<8x128xf32, #tpu.memory_space<vmem>>, vector<1x128xf32>
    %c1_2 = arith.constant 1 : index
    %c0_3 = arith.constant 0 : index
    %5 = vector.load %arg1[%c1_2, %c0_3] : memref<8x128xf32, #tpu.memory_space<vmem>>, vector<1x128xf32>
    %c2 = arith.constant 2 : index
    %c0_4 = arith.constant 0 : index
    %6 = vector.load %arg1[%c2, %c0_4] : memref<8x128xf32, #tpu.memory_space<vmem>>, vector<1x128xf32>
    %c3 = arith.constant 3 : index
    %c0_5 = arith.constant 0 : index
    %7 = vector.load %arg1[%c3, %c0_5] : memref<8x128xf32, #tpu.memory_space<vmem>>, vector<1x128xf32>
    %c4 = arith.constant 4 : index
    %c0_6 = arith.constant 0 : index
    %8 = vector.load %arg1[%c4, %c0_6] : memref<8x128xf32, #tpu.memory_space<vmem>>, vector<1x128xf32>
    %9 = vector.broadcast %0 : f32 to vector<1x128xf32>
    %10 = arith.mulf %9, %4 : vector<1x128xf32>
    %11 = vector.broadcast %1 : f32 to vector<1x128xf32>
    %12 = arith.mulf %11, %5 : vector<1x128xf32>
    %13 = arith.addf %10, %12 : vector<1x128xf32>
    %14 = vector.broadcast %2 : f32 to vector<1x128xf32>
    %15 = arith.mulf %14, %6 : vector<1x128xf32>
    %16 = vector.broadcast %3 : f32 to vector<1x128xf32>
    %17 = arith.mulf %16, %7 : vector<1x128xf32>
    %18 = arith.addf %15, %17 : vector<1x128xf32>
    %19 = arith.addf %13, %18 : vector<1x128xf32>
    %20 = arith.addf %19, %8 : vector<1x128xf32>
    %c0_7 = arith.constant 0 : index
    %c0_8 = arith.constant 0 : index
    %21 = vector.load %arg2[%c0_7, %c0_8] : memref<1x128xf32, #tpu.memory_space<vmem>>, vector<1x128xf32>
    tpu.vector_store %arg2[%c0_7, %c0_8], %20 {strides = array<i32>} : memref<1x128xf32, #tpu.memory_space<vmem>>, vector<1x128xf32>,
    return
  }
}

</mosaic_0001>

<bundles_post_ra>
// kernel: critic_forward.1
= control target key start
LH: loop header
LB: loop body
LE: loop exit
PB: predicated region body
PF: predicated region fallthrough
CT: control target
= control target key end

     0   :  { %7 = vsyncpa [#allocation5], 0  ;;  %s191_s0 = inlined_call_operand.hbm [shape: f32[2], index: 0, kind: input, shape index: {}]   ;;  %s192_s1 = inlined_call_operand.hbm [shape: f32[8,128], index: 1, kind: input, shape index: {}]   ;;  %s193_s2 = inlined_call_operand.hbm [shape: f32[1,128], index: 2, kind: output, shape index: {}]  }
   0x1   :  { %8 = vsyncpa [#allocation3], 0 }
   0x2   :  { %9 = vsyncpa [#allocation4], 0  ;;  %s77_s11 = scalar_lea.hbm %s191_s0, 16 }
   0x3   :  { %p78_p0 = scmp.ne.s32.totalorder %s191_s0, %s77_s11  ;;  %p81_p1 = scmp.lt.u32.totalorder %s77_s11, %s191_s0 }
   0x5   :  { %p83_p2 = pnand %p81_p1, %p78_p0 }
   0x7   :  { %86 = shalt.err (!%p83_p2)
}
   0x8   :  { %s137_s16 = smov [#allocation2]   ;;  %s138_s19 = smov [#allocation6]  }
   0x9   :  { %17 = dma.hbm_to_smem %s191_s0, 16, %s137_s16, [#allocation5]  }
   0xa   :  { %s24_s20 = sshll.u32 %s138_s19, 4  ;;  %s87_s23 = scalar_lea.hbm %s192_s1, 128  ;;  %s25_s20 = int_to_ptr.vmem [resolvable:$true] %s24_s20 }
   0xb   :  { %p88_p3 = scmp.ne.s32.totalorder %s192_s1, %s87_s23  ;;  %p91_p4 = scmp.lt.u32.totalorder %s87_s23, %s192_s1 }
   0xd   :  { %p93_p5 = pnand %p91_p4, %p88_p3 }
   0xf   :  { %96 = shalt.err (!%p93_p5)
}
  0x10   :  { %s97_s28 = scalar_lea.vmem %s25_s20, 128  ;;  %p102_p7 = scmp.lt.s32.totalorder %s25_s20, %s25_s20 }
  0x11   :  { %p98_p6 = scmp.ne.s32.totalorder %s25_s20, %s97_s28  ;;  %p103_p8 = scmp.lt.s32.totalorder %s97_s28, %s97_s28 }
  0x13   :  { %p104_p9 = por %p103_p8, %p102_p7 }
  0x15   :  { %p105_p10 = pnand %p104_p9, %p98_p6 }
  0x17   :  { %108 = shalt.err (!%p105_p10)
}
  0x18   :  { %27 = dma.hbm_to_vmem [thread:$0]  %s192_s1, 128, %s25_s20, [#allocation3]  }
  0x19   :  { %131 = dma.done.wait [#allocation5], 16  }
  0x1a   :  { %132 = vsyncadd [#allocation5], 4294967280 }
  0x1b   :  { %133 = dma.done.wait [#allocation3], 128  }
  0x1c   :  { %134 = vsyncadd [#allocation3], 4294967168 }
  0x1d   :  { %34 = sfence }
  0x1e   :  { %s35_s30 = sld [smem:[#allocation2]]  ;;  %s73_s3 = sld [smem:[#allocation2 + $0x1]]  ;;  %v39_v0 = vld [vmem:[#allocation6] sm:$0x1]  ;;  %v40_v1 = vld [vmem:[#allocation6 + $0x1] sm:$0x1] }
  0x1f   :  { %v41_v2 = vld [vmem:[#allocation6 + $0x2] sm:$0x1]  ;;  %v42_v5 = vld [vmem:[#allocation6 + $0x3] sm:$0x1]  ;;  %v43_v14 = vld [vmem:[#allocation6 + $0x4] sm:$0x1] }
  0x20   :  { %s139_s1 = smov [#allocation7]  }
  0x21   :  { %s63_s6 = sshll.u32 %s139_s1, 4  ;;  %s64_s6 = int_to_ptr.vmem [resolvable:$true] %s63_s6 }
  0x22   :  { %s109_s7 = scalar_lea.vmem %s64_s6, 16  ;;  %s113_s8 = scalar_lea.vmem %s64_s6, 32 }
  0x23   :  { %p110_p11 = scmp.ne.s32.totalorder %s64_s6, %s109_s7  ;;  %p114_p12 = scmp.lt.s32.totalorder %s64_s6, %s64_s6 }
  0x24   :  { %s37_s4 = smul.f32 %s35_s30, %s35_s30  ;;  %v44_v3 = vstv %s35_s30  ;;  %v46_v4 = vstv %s73_s3  ;;  %p115_p13 = scmp.lt.s32.totalorder %s113_s8, %s109_s7 }
  0x25   :  { %s38_s5 = smul.f32 %s73_s3, %s73_s3  ;;  %v45_v6 = vmul.f32 %v44_v3, %v39_v0  ;;  %v47_v7 = vmul.f32 %v46_v4, %v40_v1 }
  0x26   :  { %v49_v8 = vstv %s37_s4  ;;  %p116_p0 = por %p115_p13, %p114_p12 }
  0x27   :  { %v50_v9 = vmul.f32 %v49_v8, %v41_v2  ;;  %v51_v10 = vstv %s38_s5  ;;  %v48_v11 = vadd.f32 %v47_v7, %v45_v6 }
  0x28   :  { %v52_v12 = vmul.f32 %v51_v10, %v42_v5  ;;  %p117_p1 = pnand %p116_p0, %p110_p11 }
  0x2a   :  { %v53_v13 = vadd.f32 %v52_v12, %v50_v9 }
  0x2c   :  { %v54_v15 = vadd.f32 %v53_v13, %v48_v11 }
  0x2e   :  { %v55_v16 = vadd.f32 %v54_v15, %v43_v14 }
  0x30   :  { %56 = vst [vmem:[#allocation7] sm:$0x1] %v55_v16 }
  0x31   :  { %120 = shalt.err (!%p117_p1)
}
  0x32   :  { %s121_s11 = scalar_lea.hbm %s193_s2, 16 }
  0x33   :  { %p122_p2 = scmp.ne.s32.totalorder %s193_s2, %s121_s11  ;;  %p125_p3 = scmp.lt.u32.totalorder %s121_s11, %s193_s2 }
  0x35   :  { %p127_p4 = pnand %p125_p3, %p122_p2 }
  0x37   :  { %130 = shalt.err (!%p127_p4)
}
  0x38   :  { %66 = dma.vmem_to_hbm [thread:$0]  %s64_s6, 16, %s193_s2, [#allocation4]  }
  0x39   :  { %135 = dma.done.wait [#allocation4], 16  }
  0x3a   :  { %136 = vsyncadd [#allocation4], 4294967280 }
  0x3b   :  { %70 = vsyncpa [#allocation3], 1 }
  0x3c   :  { %71 = vsyncpa [#allocation4], 1 }
  0x3d   :  { %72 = vsyncpa [#allocation5], 1 }

</bundles_post_ra>
